<compile_context>
chip_gen: v6e
topology: v6e:2x2x1
jax: 0.10.0
libtpu: 0.0.40
codegen_flags: <defaults>
</compile_context>

<pallas_src>
import jax
import jax.numpy as jnp
from jax.experimental import pallas as pl
from jax.experimental.pallas import tpu as pltpu

EPS = 1e-5      # nn.InstanceNorm1d default
K = 5           # kernel_size
STRIDE = 2
PAD_LEFT = 4


def _g_downsample_kernel(x_ref, w_ref, o_ref):
    # x_ref: (1, 2, C_in, L_half)  padded input de-interleaved into even/odd
    #                              time positions, one batch element
    # w_ref: (K, 2*C_out, C_in)    fused conv + conv_gate weights, per tap
    # o_ref: (1, C_out, L_out)     output, PyTorch NCL layout
    C_out = o_ref.shape[1]
    L_out = o_ref.shape[2]

    x = x_ref[0].astype(jnp.float32)        # (2, C_in, L_half)
    w = w_ref[...].astype(jnp.float32)      # (K, 2*C_out, C_in)

    # Strided conv as a sum of K tap matmuls on the MXU.
    # Output position t, tap k reads the padded input at index 2*t + k, i.e.
    # the (k % 2) parity plane shifted by k // 2 (unit-stride slice).
    acc = jnp.zeros((2 * C_out, L_out), jnp.float32)
    for k in range(K):
        tap = x[k % 2, :, k // 2:k // 2 + L_out]          # (C_in, L_out)
        acc = acc + jnp.dot(w[k], tap, preferred_element_type=jnp.float32)

    # InstanceNorm1d (affine=False) over the length axis, single-pass stats.
    mean = jnp.mean(acc, axis=1, keepdims=True)
    mean_sq = jnp.mean(acc * acc, axis=1, keepdims=True)
    var = jnp.maximum(mean_sq - mean * mean, 0.0)
    y = (acc - mean) * jax.lax.rsqrt(var + EPS)

    # GLU: first C_out rows are the value path, last C_out rows the gate path.
    o_ref[0] = (y[:C_out] * jax.nn.sigmoid(y[C_out:])).astype(o_ref.dtype)


def g_downsample(x, w, b, wg, bg):
    """x: (N, C_in, L) f32.  w/wg: (C_out, C_in, K).  b/bg: (C_out,).

    b/bg are accepted for API parity but unused: a constant per-channel bias
    is exactly cancelled by InstanceNorm1d (affine=False).
    """
    del b, bg
    N, C_in, L = x.shape
    C_out = w.shape[0]
    L_out = (L + PAD_LEFT - K) // STRIDE + 1
    L_half = L_out + 2            # even-parity plane needs taps up to offset 2

    # ReplicationPad1d((4, 0)): repeat the first time step 4 times on the left.
    x_pad = jnp.concatenate(
        [jnp.repeat(x[:, :, :1], PAD_LEFT, axis=2), x], axis=2)

    # De-interleave into even / odd time positions so the stride-2 conv taps
    # become unit-stride slices inside the kernel.  Total HBM data stays 1x.
    def _fit(v):
        pad = L_half - v.shape[2]
        if pad > 0:
            v = jnp.pad(v, ((0, 0), (0, 0), (0, pad)))    # tail never read
        return v[:, :, :L_half]

    x_de = jnp.stack([_fit(x_pad[:, :, 0::2]), _fit(x_pad[:, :, 1::2])],
                     axis=1)                               # (N, 2, C_in, L_half)

    # Fuse conv + conv_gate weights and lay out per tap: (K, 2*C_out, C_in).
    w_taps = jnp.transpose(jnp.concatenate([w, wg], axis=0), (2, 0, 1))

    out = pl.pallas_call(
        _g_downsample_kernel,
        out_shape=jax.ShapeDtypeStruct((N, C_out, L_out), x.dtype),
        grid_spec=pltpu.PrefetchScalarGridSpec(
            num_scalar_prefetch=0,
            grid=(N,),
            in_specs=[
                pl.BlockSpec((1, 2, C_in, L_half), lambda n: (n, 0, 0, 0)),
                pl.BlockSpec((K, 2 * C_out, C_in), lambda n: (0, 0, 0)),
            ],
            out_specs=pl.BlockSpec((1, C_out, L_out), lambda n: (n, 0, 0)),
        ),
        compiler_params=pltpu.CompilerParams(
            dimension_semantics=("parallel",)),
    )(x_de, w_taps)

    return out  # already in PyTorch NCL layout (N, C_out, L_out)


def _reference(x, w, b, wg, bg):
    """Pure-JAX reference of the PyTorch forward (with biases), sanity check."""
    x_pad = jnp.concatenate(
        [jnp.repeat(x[:, :, :1], PAD_LEFT, axis=2), x], axis=2)
    y = jax.lax.conv_general_dilated(
        x_pad, w, window_strides=(STRIDE,), padding="VALID",
        dimension_numbers=("NCH", "OIH", "NCH")) + b[None, :, None]
    yg = jax.lax.conv_general_dilated(
        x_pad, wg, window_strides=(STRIDE,), padding="VALID",
        dimension_numbers=("NCH", "OIH", "NCH")) + bg[None, :, None]

    def inorm(v):
        m = jnp.mean(v, axis=2, keepdims=True)
        s = jnp.mean((v - m) ** 2, axis=2, keepdims=True)
        return (v - m) * jax.lax.rsqrt(s + EPS)

    return inorm(y) * jax.nn.sigmoid(inorm(yg))


if __name__ == "__main__":
    key = jax.random.PRNGKey(0)
    k_x, k_w, k_b, k_wg, k_bg = jax.random.split(key, 5)

    N, C_in, L = 2, 4, 16
    C_out = 8

    x = jax.random.normal(k_x, (N, C_in, L), dtype=jnp.float32)

    # Deterministic parameter init (PyTorch-style uniform(-1/sqrt(fan_in), ..)).
    fan_in = C_in * K
    bound = 1.0 / jnp.sqrt(fan_in)
    w = jax.random.uniform(k_w, (C_out, C_in, K), jnp.float32, -bound, bound)
    b = jax.random.uniform(k_b, (C_out,), jnp.float32, -bound, bound)
    wg = jax.random.uniform(k_wg, (C_out, C_in, K), jnp.float32, -bound, bound)
    bg = jax.random.uniform(k_bg, (C_out,), jnp.float32, -bound, bound)

    out = g_downsample(x, w, b, wg, bg)
    jax.block_until_ready(out)

    ref = _reference(x, w, b, wg, bg)
    L_out = (L + PAD_LEFT - K) // STRIDE + 1
    assert out.shape == ref.shape == (N, C_out, L_out)
    assert jnp.allclose(out, ref, atol=1e-4, rtol=1e-4), "mismatch vs reference"

    print("KERNEL_OK")
</pallas_src>

<mosaic_0001>
module attributes {stable_mosaic.version = 11 : i64} {
  func.func @_g_downsample_kernel(%arg0: i32, %arg1: memref<1x2x4x10xf32, #tpu.memory_space<vmem>>, %arg2: memref<5x16x4xf32, #tpu.memory_space<vmem>>, %arg3: memref<1x8x8xf32, #tpu.memory_space<vmem>>) attributes {dimension_semantics = [#tpu.dimension_semantics<parallel>], iteration_bounds = array<i64: 2>, scalar_prefetch = 0 : i64, scratch_operands = 0 : i64, tpu.core_type = #tpu.core_type<tc>, window_params = [{transform_indices = @transform_0, window_bounds = array<i64: 1, 2, 4, 10>}, {pipeline_mode = #tpu.pipeline_mode<synchronous>, transform_indices = @transform_1, window_bounds = array<i64: 5, 16, 4>}, {transform_indices = @transform_2, window_bounds = array<i64: 1, 8, 8>}]} {
    %c0 = arith.constant 0 : index
    %c0_0 = arith.constant 0 : index
    %c0_1 = arith.constant 0 : index
    %c0_2 = arith.constant 0 : index
    %0 = vector.load %arg1[%c0, %c0_0, %c0_1, %c0_2] : memref<1x2x4x10xf32, #tpu.memory_space<vmem>>, vector<1x2x4x10xf32>
    %1 = vector.shape_cast %0 : vector<1x2x4x10xf32> to vector<2x4x10xf32>
    %c0_3 = arith.constant 0 : index
    %c0_4 = arith.constant 0 : index
    %c0_5 = arith.constant 0 : index
    %2 = vector.load %arg2[%c0_3, %c0_4, %c0_5] : memref<5x16x4xf32, #tpu.memory_space<vmem>>, vector<5x16x4xf32>
    %cst = arith.constant 0.000000e+00 : f32
    %3 = vector.broadcast %cst : f32 to vector<16x8xf32>
    %4 = vector.extract_strided_slice %1 {offsets = [0, 0, 0], sizes = [1, 4, 8], strides = [1, 1, 1]} : vector<2x4x10xf32> to vector<1x4x8xf32>
    %5 = vector.shape_cast %4 : vector<1x4x8xf32> to vector<4x8xf32>
    %6 = vector.extract_strided_slice %2 {offsets = [0, 0, 0], sizes = [1, 16, 4], strides = [1, 1, 1]} : vector<5x16x4xf32> to vector<1x16x4xf32>
    %7 = vector.shape_cast %6 : vector<1x16x4xf32> to vector<16x4xf32>
    %cst_6 = arith.constant dense<0.000000e+00> : vector<16x8xf32>
    %8 = tpu.matmul %7, %5, %cst_6 {dimension_numbers = #tpu.dot_dimension_numbers<[1], [0], [0], [1], [0, 0, 1, 1], [], []>} : vector<16x4xf32>, vector<4x8xf32>, vector<16x8xf32> -> vector<16x8xf32>
    %9 = arith.addf %3, %8 : vector<16x8xf32>
    %10 = vector.extract_strided_slice %1 {offsets = [1, 0, 0], sizes = [1, 4, 8], strides = [1, 1, 1]} : vector<2x4x10xf32> to vector<1x4x8xf32>
    %11 = vector.shape_cast %10 : vector<1x4x8xf32> to vector<4x8xf32>
    %12 = vector.extract_strided_slice %2 {offsets = [1, 0, 0], sizes = [1, 16, 4], strides = [1, 1, 1]} : vector<5x16x4xf32> to vector<1x16x4xf32>
    %13 = vector.shape_cast %12 : vector<1x16x4xf32> to vector<16x4xf32>
    %cst_7 = arith.constant dense<0.000000e+00> : vector<16x8xf32>
    %14 = tpu.matmul %13, %11, %cst_7 {dimension_numbers = #tpu.dot_dimension_numbers<[1], [0], [0], [1], [0, 0, 1, 1], [], []>} : vector<16x4xf32>, vector<4x8xf32>, vector<16x8xf32> -> vector<16x8xf32>
    %15 = arith.addf %9, %14 : vector<16x8xf32>
    %16 = vector.extract_strided_slice %1 {offsets = [0, 0, 1], sizes = [1, 4, 8], strides = [1, 1, 1]} : vector<2x4x10xf32> to vector<1x4x8xf32>
    %17 = vector.shape_cast %16 : vector<1x4x8xf32> to vector<4x8xf32>
    %18 = vector.extract_strided_slice %2 {offsets = [2, 0, 0], sizes = [1, 16, 4], strides = [1, 1, 1]} : vector<5x16x4xf32> to vector<1x16x4xf32>
    %19 = vector.shape_cast %18 : vector<1x16x4xf32> to vector<16x4xf32>
    %cst_8 = arith.constant dense<0.000000e+00> : vector<16x8xf32>
    %20 = tpu.matmul %19, %17, %cst_8 {dimension_numbers = #tpu.dot_dimension_numbers<[1], [0], [0], [1], [0, 0, 1, 1], [], []>} : vector<16x4xf32>, vector<4x8xf32>, vector<16x8xf32> -> vector<16x8xf32>
    %21 = arith.addf %15, %20 : vector<16x8xf32>
    %22 = vector.extract_strided_slice %1 {offsets = [1, 0, 1], sizes = [1, 4, 8], strides = [1, 1, 1]} : vector<2x4x10xf32> to vector<1x4x8xf32>
    %23 = vector.shape_cast %22 : vector<1x4x8xf32> to vector<4x8xf32>
    %24 = vector.extract_strided_slice %2 {offsets = [3, 0, 0], sizes = [1, 16, 4], strides = [1, 1, 1]} : vector<5x16x4xf32> to vector<1x16x4xf32>
    %25 = vector.shape_cast %24 : vector<1x16x4xf32> to vector<16x4xf32>
    %cst_9 = arith.constant dense<0.000000e+00> : vector<16x8xf32>
    %26 = tpu.matmul %25, %23, %cst_9 {dimension_numbers = #tpu.dot_dimension_numbers<[1], [0], [0], [1], [0, 0, 1, 1], [], []>} : vector<16x4xf32>, vector<4x8xf32>, vector<16x8xf32> -> vector<16x8xf32>
    %27 = arith.addf %21, %26 : vector<16x8xf32>
    %28 = vector.extract_strided_slice %1 {offsets = [0, 0, 2], sizes = [1, 4, 8], strides = [1, 1, 1]} : vector<2x4x10xf32> to vector<1x4x8xf32>
    %29 = vector.shape_cast %28 : vector<1x4x8xf32> to vector<4x8xf32>
    %30 = vector.extract_strided_slice %2 {offsets = [4, 0, 0], sizes = [1, 16, 4], strides = [1, 1, 1]} : vector<5x16x4xf32> to vector<1x16x4xf32>
    %31 = vector.shape_cast %30 : vector<1x16x4xf32> to vector<16x4xf32>
    %cst_10 = arith.constant dense<0.000000e+00> : vector<16x8xf32>
    %32 = tpu.matmul %31, %29, %cst_10 {dimension_numbers = #tpu.dot_dimension_numbers<[1], [0], [0], [1], [0, 0, 1, 1], [], []>} : vector<16x4xf32>, vector<4x8xf32>, vector<16x8xf32> -> vector<16x8xf32>
    %33 = arith.addf %27, %32 : vector<16x8xf32>
    %cst_11 = arith.constant dense<0.000000e+00> : vector<16xf32>
    %34 = vector.multi_reduction <add>, %33, %cst_11 [1] : vector<16x8xf32> to vector<16xf32>
    %35 = vector.shape_cast %34 : vector<16xf32> to vector<16x1xf32>
    %cst_12 = arith.constant 8.000000e+00 : f32
    %36 = vector.broadcast %cst_12 : f32 to vector<16x1xf32>
    %37 = arith.divf %35, %36 : vector<16x1xf32>
    %38 = arith.mulf %33, %33 : vector<16x8xf32>
    %cst_13 = arith.constant dense<0.000000e+00> : vector<16xf32>
    %39 = vector.multi_reduction <add>, %38, %cst_13 [1] : vector<16x8xf32> to vector<16xf32>
    %40 = vector.shape_cast %39 : vector<16xf32> to vector<16x1xf32>
    %cst_14 = arith.constant 8.000000e+00 : f32
    %41 = vector.broadcast %cst_14 : f32 to vector<16x1xf32>
    %42 = arith.divf %40, %41 : vector<16x1xf32>
    %43 = arith.mulf %37, %37 : vector<16x1xf32>
    %44 = arith.subf %42, %43 : vector<16x1xf32>
    %cst_15 = arith.constant 0.000000e+00 : f32
    %45 = vector.broadcast %cst_15 : f32 to vector<16x1xf32>
    %46 = arith.maximumf %44, %45 : vector<16x1xf32>
    %47 = vector.broadcast %37 : vector<16x1xf32> to vector<16x8xf32>
    %48 = arith.subf %33, %47 : vector<16x8xf32>
    %cst_16 = arith.constant 9.99999974E-6 : f32
    %49 = vector.broadcast %cst_16 : f32 to vector<16x1xf32>
    %50 = arith.addf %46, %49 : vector<16x1xf32>
    %51 = math.rsqrt %50 : vector<16x1xf32>
    %52 = vector.broadcast %51 : vector<16x1xf32> to vector<16x8xf32>
    %53 = arith.mulf %48, %52 : vector<16x8xf32>
    %54 = vector.extract_strided_slice %53 {offsets = [0, 0], sizes = [8, 8], strides = [1, 1]} : vector<16x8xf32> to vector<8x8xf32>
    %55 = vector.extract_strided_slice %53 {offsets = [8, 0], sizes = [8, 8], strides = [1, 1]} : vector<16x8xf32> to vector<8x8xf32>
    %56 = arith.negf %55 : vector<8x8xf32>
    %57 = math.exp %56 : vector<8x8xf32>
    %cst_17 = arith.constant 1.000000e+00 : f32
    %58 = vector.broadcast %cst_17 : f32 to vector<8x8xf32>
    %59 = arith.addf %58, %57 : vector<8x8xf32>
    %60 = arith.divf %58, %59 : vector<8x8xf32>
    %61 = arith.mulf %54, %60 : vector<8x8xf32>
    %c0_18 = arith.constant 0 : index
    %c0_19 = arith.constant 0 : index
    %c0_20 = arith.constant 0 : index
    %62 = vector.load %arg3[%c0_18, %c0_19, %c0_20] : memref<1x8x8xf32, #tpu.memory_space<vmem>>, vector<1x8x8xf32>
    %63 = vector.shape_cast %62 : vector<1x8x8xf32> to vector<8x8xf32>
    %64 = vector.shape_cast %61 : vector<8x8xf32> to vector<1x8x8xf32>
    tpu.vector_store %arg3[%c0_18, %c0_19, %c0_20], %64 {strides = array<i32>} : memref<1x8x8xf32, #tpu.memory_space<vmem>>, vector<1x8x8xf32>,
    return
  }
  func.func @transform_0(%arg0: i32) -> (i32, i32, i32, i32) {
    %c0_i32 = arith.constant 0 : i32
    %c0_i32_0 = arith.constant 0 : i32
    %c0_i32_1 = arith.constant 0 : i32
    %c0_i32_2 = arith.constant 0 : i32
    return %arg0, %c0_i32, %c0_i32_0, %c0_i32_1 : i32, i32, i32, i32
  }
  func.func @transform_1(%arg0: i32) -> (i32, i32, i32) {
    %c0_i32 = arith.constant 0 : i32
    %c0_i32_0 = arith.constant 0 : i32
    %c0_i32_1 = arith.constant 0 : i32
    %c0_i32_2 = arith.constant 0 : i32
    return %c0_i32, %c0_i32_0, %c0_i32_1 : i32, i32, i32
  }
  func.func @transform_2(%arg0: i32) -> (i32, i32, i32) {
    %c0_i32 = arith.constant 0 : i32
    %c0_i32_0 = arith.constant 0 : i32
    %c0_i32_1 = arith.constant 0 : i32
    return %arg0, %c0_i32, %c0_i32_0 : i32, i32, i32
  }
}

</mosaic_0001>

<bundles_post_ra>
// kernel: tpu_custom_call.1
= control target key start
LH: loop header
LB: loop body
LE: loop exit
PB: predicated region body
PF: predicated region fallthrough
CT: control target
= control target key end

     0   :  { %7 = vsyncpa [#allocation3], 0  ;;  %s1039_s0 = inlined_call_operand.vmem [shape: f32[2,2,4,10], index: 0, kind: input, shape index: {}]   ;;  %s1040_s1 = inlined_call_operand.vmem [shape: f32[5,16,4], index: 1, kind: input, shape index: {}]   ;;  %s1041_s2 = inlined_call_operand.hbm [shape: f32[2,8,8], index: 2, kind: output, shape index: {}]  }
   0x1   :  { %9 = vsyncpa [#allocation3 + $0x1], 0  ;;  %s897_s9 = smov 0   ;;  %s899_s10 = smov 0  }
   0x2   :  { %s901_s11 = smov 0   ;;  %s903_s12 = smov 0  }
   0x3 LB: > { %s918_s13 = sadd.s32 4294967295, %s877_s12   ;;  %s700_s14 = sadd.s32 4294967294, %s877_s12   ;;  %s877_s12 = sphi %s903_s12, %s1047_s12   ;;  %s873_s11 = sphi %s901_s11, %s1046_s11   ;;  %s869_s10 = sphi %s899_s10, %s1045_s10   ;;  %s865_s9 = sphi %s897_s9, %s1044_s9  }
   0x4   : > { %s922_s15 = sadd.s32 1, %s877_s12   ;;  %s69_s16 = sadd.s32 1, %s873_s11 }
   0x5   : > { %s66_s17 = ssub.s32 %s877_s12, %s922_s15  ;;  %p79_p0 = scmp.ne.s32.totalorder %s873_s11, %s869_s10 }
   0x6   : > { %p67_p1 = scmp.eq.s32.totalorder %s66_s17, 0  ;;  %p80_p2 = scmp.eq.s32.totalorder %s918_s13, 1 }
   0x7   : > { %p85_p3 = scmp.ne.s32.totalorder %s869_s10, %s865_s9  ;;  %p86_p4 = scmp.eq.s32.totalorder %s700_s14, 1 }
   0x8   : > { %s933_s18 = scalar_select %p67_p1, %s873_s11, %s69_s16  }
   0x9   : > { %p935_p5 = por %p80_p2, %p79_p0  ;;  %p939_p6 = por %p86_p4, %p85_p3 }
   0xa   : > { %p703_p7 = scmp.ge.s32.totalorder %s877_s12, 1  ;;  %p115_p8 = scmp.lt.s32.totalorder %s877_s12, 3 }
   0xc   : > { %p116_p9 = pnand %p703_p7, %p115_p8 }
   0xd   : > { %p137_p10 = scmp.lt.s32.totalorder (!%p116_p9), %s918_s13, 1  ;;  %s879_s4 = smov (!%p116_p9), 127  }
   0xe   : > { %119 = sbr.rel (%p116_p9) target bundleno = 554 (0x22a), region = 28  ;;  %s880_s5 = smov (!%p116_p9), 126  }
   0xf   : > { %s724_s3 = sshll.u32 (!%p116_p9), %s918_s13, 7  ;;  %s881_s17 = smov (!%p116_p9), [#allocation2]  }
  0x10   : > { %s639_s8 = scalar_lea.hbm (!%p116_p9), %s1041_s2, %s724_s3 }
  0x13   : > { %v146_v0 = vld [vmem:[%s1040_s1 + $0x10] sm:$0xff]  ;;  %vm154_vm0 = vcmask 31744   ;;  %v144_v1 = vld [vmem:[%s1040_s1] sm:$0xff]  ;;  %s138_s25 = scalar_select %p137_p10, %s918_s13, 1  ;;  %vm161_vm1 = vcmask 1043456   ;;  %v147_v3 = vld [vmem:[%s1040_s1 + $0x18] sm:$0xff] }
  0x14   : > { %745 = vmatprep.mubr.msk.f32.mxu0 %vm154_vm0, %v146_v0  ;;  %750 = vmatprep.mubr.msk.f32.mxu1 %vm154_vm0, %v144_v1  ;;  %v145_v5 = vld [vmem:[%s1040_s1 + $0x8] sm:$0xff]  ;;  %v148_v6 = vld [vmem:[%s1040_s1 + $0x20] sm:$0xff]  ;;  %v150_v7 = vld [vmem:[%s1040_s1 + $0x30] sm:$0xff]  ;;  %vm585_vm2 = vcmask 64512   ;;  %s821_s13 = sshll.u32 %s881_s17, 4  ;;  %s822_s13 = int_to_ptr.vmem [resolvable:$false] %s821_s13 }
  0x15   : > { %s727_s26 = sshll.u32 %s138_s25, 3  ;;  %v149_v9 = vld [vmem:[%s1040_s1 + $0x28] sm:$0xff]  ;;  %v152_v11 = vld [vmem:[%s1040_s1 + $0x40] sm:$0xff]  ;;  %v151_v13 = vld [vmem:[%s1040_s1 + $0x38] sm:$0xff]  ;;  %s823_s21 = scalar_lea.vmem %s822_s13, 256 }
  0x16   : > { %s141_s29 = scalar_lea.vmem %s1039_s0, %s727_s26  ;;  %v153_v14 = vld [vmem:[%s1040_s1 + $0x48] sm:$0xff] }
  0x17   : > { %v142_v2 = vld [vmem:[%s141_s29] sm:$0xf]  ;;  %v143_v4 = vld [vmem:[%s141_s29 + $0x4] sm:$0xf]  ;;  %s134_s29 = sand.u32 1, %s869_s10  }
  0x18   : > { %324 = vrot.lane.b32.xlu0 %v142_v2, %s879_s4  ;;  %498 = vrot.lane.b32.xlu1 %v142_v2, %s880_s5  ;;  %s704_s30 = sshll.u32 %s134_s29, 3  ;;  %s628_s14 = scalar_lea.sflag [#allocation3], %s134_s29 }
  0x19   : > { %743 = vmatprep.subr.msk.mxu0 %vm161_vm1, %v143_v4  ;;  %748 = vmatprep.subr.msk.mxu1 %vm161_vm1, %v142_v2 }
  0x1a   : > { %744 = vmatpush3.msk.msra.mxu0 %vm161_vm1, %v143_v4  ;;  %749 = vmatpush3.msk.msra.mxu1 %vm161_vm1, %v142_v2 }
  0x1b   : > { %746 = vmatmul.mubr.msk.f32.vlgmr.msra.gmra.mxu0 %vm154_vm0, %v147_v3  ;;  %751 = vmatmul.mubr.msk.f32.vlgmr.msra.gmra.mxu1 %vm154_vm0, %v145_v5 }
  0x1c   : > { %411 = vrot.lane.b32.xlu0 %v143_v4, %s879_s4  ;;  %755 = vmatprep.mubr.msk.f32.mxu0 %vm154_vm0, %v148_v6  ;;  %s136_s4 = scalar_lea.vmem [#allocation2], %s704_s30 }
  0x1d   : > { %760 = vmatprep.mubr.msk.f32.mxu1 %vm154_vm0, %v150_v7  ;;  %s641_s5 = sshll.u32 %s136_s4, 4  ;;  %s642_s5 = int_to_ptr.vmem [resolvable:$true] %s641_s5 }
  0x1e   : > { %s817_s16 = scalar_lea.vmem %s642_s5, 128  ;;  %p824_p0 = scmp.lt.s32.totalorder %s642_s5, %s822_s13 }
  0x1f   : > { %p818_p11 = scmp.ne.s32.totalorder %s642_s5, %s817_s16  ;;  %p825_p1 = scmp.lt.s32.totalorder %s823_s21, %s817_s16 }
  0x21   : > { %p819_p12 = pnand %p818_p11, %p935_p5  ;;  %p826_p2 = por %p825_p1, %p824_p0 }
  0x23   : > { %p820_p13 = pneg %p819_p12 }
  0x25   : > { %p827_p3 = pnand %p826_p2, %p820_p13 }
  0x8a   : > { %v325_v8 = vpop.permute.xlu0 %324  ;;  %v499_v10 = vpop.permute.xlu1 %498 }
  0x8b   : > { %753 = vmatprep.subr.msk.mxu0 %vm161_vm1, %v325_v8 }
  0x8c   : > { %754 = vmatpush3.msk.msra.mxu0 %vm161_vm1, %v325_v8 }
  0x8d   : > { %756 = vmatmul.mubr.msk.f32.vlgmr.msra.gmra.mxu0 %vm154_vm0, %v149_v9  ;;  %763 = vmatprep.subr.msk.mxu0 %vm161_vm1, %v499_v10 }
  0x8e   : > { %v412_v12 = vpop.permute.xlu0 %411  ;;  %764 = vmatpush3.msk.msra.mxu0 %vm161_vm1, %v499_v10  ;;  %765 = vmatprep.mubr.msk.f32.mxu0 %vm154_vm0, %v152_v11 }
  0x8f   : > { %758 = vmatprep.subr.msk.mxu1 %vm161_vm1, %v412_v12 }
  0x90   : > { %759 = vmatpush3.msk.msra.mxu1 %vm161_vm1, %v412_v12 }
  0x91   : > { %761 = vmatmul.mubr.msk.f32.vlgmr.msra.gmra.mxu1 %vm154_vm0, %v151_v13  ;;  %766 = vmatmul.mubr.msk.f32.vlgmr.msra.gmra.mxu0 %vm154_vm0, %v153_v14 }
  0xdb   : > { %v747_v15 = vpop.f32.mrf.mxu0  ;;  %v752_v17 = vpop.f32.mrf.mxu1 }
  0xdc   : > { %v321_v18 = vadd.f32 %v752_v17, %v747_v15 }
  0xdd   : > { %v231_v16 = vpop.f32.mrf.mxu0  ;;  %v315_v19 = vpop.f32.mrf.mxu1 }
  0xde   : > { %v316_v22 = vadd.f32 %v315_v19, %v231_v16 }
 0x14d   : > { %v757_v20 = vpop.f32.mrf.mxu0 }
 0x14e   : > { %v410_v23 = vadd.f32 %v757_v20, %v321_v18 }
 0x14f   : > { %v400_v21 = vpop.f32.mrf.mxu0 }
 0x150   : > { %v409_v26 = vadd.f32 %v400_v21, %v316_v22 }
 0x151   : > { %v762_v24 = vpop.f32.mrf.mxu1  ;;  %v767_v25 = vpop.f32.mrf.mxu0 }
 0x152   : > { %v497_v27 = vadd.f32 %v762_v24, %v410_v23 }
 0x153   : > { %v487_v28 = vpop.f32.mrf.mxu1  ;;  %v574_v31 = vpop.f32.mrf.mxu0 }
 0x154   : > { %v496_v29 = vadd.f32 %v487_v28, %v409_v26  ;;  %v584_v30 = vadd.f32 %v767_v25, %v497_v27 }
 0x156   : > { %v583_v32 = vadd.f32 %v574_v31, %v496_v29  ;;  %v589_v33 = vsel %vm585_vm2, %v584_v30, 0.0  ;;  %v596_v34 = vmul.f32 %v584_v30, %v584_v30 }
 0x157   : > { %590 = vadd.xlane.f32.xlu1 %v589_v33 }
 0x158   : > { %v600_v35 = vsel %vm585_vm2, %v596_v34, 0.0  ;;  %v595_v36 = vmul.f32 %v583_v32, %v583_v32  ;;  %v586_v38 = vsel %vm585_vm2, %v583_v32, 0.0 }
 0x159   : > { %601 = vadd.xlane.f32.xlu0 %v600_v35 }
 0x15a   : > { %v597_v37 = vsel %vm585_vm2, %v595_v36, 0.0 }
 0x15b   : > { %598 = vadd.xlane.f32.xlu1 %v597_v37 }
 0x15d   : > { %587 = vadd.xlane.f32.xlu0 %v586_v38 }
 0x1e0   : > { %v591_v39 = vpop.xlane.xlu1 %590 }
 0x1e1   : > { %v594_v40 = vmul.f32 0.125, %v591_v39 }
 0x1e2   : > { %v602_v41 = vpop.xlane.xlu0 %601 }
 0x1e3   : > { %v606_v42 = vmul.f32 %v594_v40, %v594_v40  ;;  %v604_v43 = vmul.f32 0.125, %v602_v41  ;;  %v612_v49 = vsub.f32 %v584_v30, %v594_v40 }
 0x1e4   : > { %v599_v51 = vpop.xlane.xlu1 %598 }
 0x1e5   : > { %v608_v44 = vsub.f32 %v604_v43, %v606_v42  ;;  %v603_v55 = vmul.f32 0.125, %v599_v51 }
 0x1e6   : > { %v588_v47 = vpop.xlane.xlu0 %587 }
 0x1e7   : > { %v610_v45 = vmax.f32 %v608_v44, 0.0  ;;  %v593_v48 = vmul.f32 0.125, %v588_v47 }
 0x1e9   : > { %v614_v46 = vadd.f32 1e-05, %v610_v45  ;;  %v605_v53 = vmul.f32 %v593_v48, %v593_v48  ;;  %v611_v62 = vsub.f32 %v583_v32, %v593_v48 }
 0x1eb   : > { %809 = vrsqrt.f32 %v614_v46  ;;  %v607_v56 = vsub.f32 %v603_v55, %v605_v53 }
 0x1ed   : > { %v609_v57 = vmax.f32 %v607_v56, 0.0 }
 0x1ef   : > { %v613_v58 = vadd.f32 1e-05, %v609_v57 }
 0x1f8   : > { %v810_v50 = vpop.eup %809 }
 0x1f9   : > { %v618_v52 = vmul.f32 %v810_v50, %v612_v49 }
 0x1fb   : > { %v722_v54 = vmul.f32 -1.442695, %v618_v52 }
 0x1fd   : > { %811 = vpow2.f32 %v722_v54 }
 0x1fe   : > { %813 = vrsqrt.f32 %v613_v58 }
 0x20a   : > { %v812_v59 = vpop.eup %811 }
 0x20b   : > { %v622_v60 = vadd.f32 1.0, %v812_v59  ;;  %v814_v61 = vpop.eup %813 }
 0x20c   : > { %v617_v63 = vmul.f32 %v814_v61, %v611_v62 }
 0x20d   : > { %815 = vrcp.f32 %v622_v60 }
 0x21a   : > { %v816_v0 = vpop.eup %815 }
 0x21b   : > { %v625_v1 = vmul.f32 %v816_v0, %v617_v63 }
 0x21d   : > { %626 = vst.msk [vmem:[%s136_s4] sm:$0xff] %vm585_vm2, %v625_v1 }
 0x21e   : > { %830 = shalt.err (!%p827_p3)
}
 0x21f   : > { %s831_s22 = scalar_lea.hbm %s639_s8, 128  ;;  %s835_s25 = scalar_lea.hbm %s1041_s2, 256 }
 0x220   : > { %p832_p4 = scmp.ne.s32.totalorder %s639_s8, %s831_s22  ;;  %p836_p9 = scmp.lt.s32.totalorder %s639_s8, %s1041_s2 }
 0x221   : > { %p837_p10 = scmp.lt.s32.totalorder %s835_s25, %s831_s22 }
 0x222   : > { %p833_p7 = pnand %p832_p4, %p935_p5 }
 0x223   : > { %p838_p11 = por %p837_p10, %p836_p9 }
 0x224   : > { %p834_p8 = pneg %p833_p7 }
 0x226   : > { %p839_p12 = pnand %p838_p11, %p834_p8 }
 0x228   : > { %842 = shalt.err (!%p839_p12)
}
 0x229   : > { %768 = dma.vmem_to_hbm [thread:$0]  (%p935_p5), %s642_s5, 128, %s639_s8, %s628_s14  }
 0x22a PF: > { %p774_p13 = scmp.ge.s32.totalorder %s877_s12, 2  ;;  %s653_s28 = sand.u32 1, %s865_s9  }
 0x22b   : > { %s654_s29 = scalar_lea.sflag [#allocation3], %s653_s28 }
 0x22c   : > { %p771_p0 = pnand %p774_p13, %p939_p6 }
 0x22e   : > { %p772_p1 = pneg %p771_p0 }
 0x230   : > { %860 = dma.done.wait (%p772_p1), %s654_s29, 128  }
 0x231   : > { %862 = vsyncadd (%p772_p1), %s654_s29, 4294967168  ;;  %p12_p2 = scmp.ge.s32.totalorder %s922_s15, 4   ;;  %s1044_s9 = smov %s869_s10 }
 0x232   : > { %s1045_s10 = smov %s873_s11  ;;  %s1046_s11 = smov %s933_s18 }
 0x233   : > { %s1047_s12 = smov %s922_s15  ;;  %14 = sbr.rel (!%p12_p2) target bundleno = 3 (0x3), region = 63 }
 0x238   :  { %659 = vsyncpa [#allocation3], 1 }
 0x239   :  { %661 = vsyncpa [#allocation3 + $0x1], 1 }

</bundles_post_ra>
